<compile_context>
chip_gen: v7x
topology: tpu7x:2x2x1
jax: 0.10.0
libtpu: 0.0.40
codegen_flags: <defaults>
</compile_context>

<pallas_src>
import math
from functools import partial

import jax
import jax.numpy as jnp
from jax.experimental import pallas as pl
from jax.experimental.pallas import tpu as pltpu


# ---------------------------------------------------------------------------
# Kernel A: fused Q / K / V projections (wide, lane-dense matmuls).
# ---------------------------------------------------------------------------
def _qkv_proj_kernel(y_ref, x_ref, wq_ref, wkv_ref, q_out_ref, kv_out_ref):
    yb = y_ref[...].astype(jnp.bfloat16)          # (bt, e)
    xb = x_ref[...].astype(jnp.bfloat16)          # (bt, e)
    # (bt, e) @ (e, h*e)   and   (bt, e) @ (e, 2*h*e) : lane-dense outputs.
    q = jnp.dot(yb, wq_ref[...], preferred_element_type=jnp.float32)
    kv = jnp.dot(xb, wkv_ref[...], preferred_element_type=jnp.float32)
    q_out_ref[...] = q.astype(q_out_ref.dtype)
    kv_out_ref[...] = kv.astype(kv_out_ref.dtype)


# ---------------------------------------------------------------------------
# Kernel B: per-head scaled-dot-product attention + unifyheads projection.
# Inputs are already in (h, t, e) head-major layout (leading batch dim),
# so every contraction is a plain batched dot_general on the MXU.
# ---------------------------------------------------------------------------
def _attn_unify_kernel(q_ref, k_ref, v_ref, wu_ref, b_ref, out_ref, *, emb):
    q = q_ref[...]                                # (h, tq, e) bf16
    k = k_ref[...]                                # (h, t,  e) bf16
    v = v_ref[...]                                # (h, t,  e) bf16

    # scores[h, q, k] = sum_d q[h,q,d] * k[h,k,d]  (no k.T materialization)
    scores = jnp.einsum("hqd,hkd->hqk", q, k,
                        preferred_element_type=jnp.float32)
    scores = scores * (1.0 / math.sqrt(emb))      # (q/e^0.25)·(k/e^0.25)

    # Numerically-stable softmax over the key axis; defer the 1/denom scale.
    m = jnp.max(scores, axis=-1, keepdims=True)
    p = jnp.exp(scores - m)                       # (h, tq, t)
    denom = jnp.sum(p, axis=-1, keepdims=True)
    inv = pl.reciprocal(denom, approx=True)       # EUP, effectively free

    ctx = jnp.einsum("hqk,hkd->hqd", p.astype(jnp.bfloat16), v,
                     preferred_element_type=jnp.float32)   # (h, tq, e)
    ctx = ctx * inv                               # normalize the small output

    # unifyheads: out[q, eo] = sum_h ctx[h, q, :] @ Wu[h, :, eo]  + bias
    per_head = jnp.einsum("hqc,hce->hqe", ctx.astype(jnp.bfloat16), wu_ref[...],
                          preferred_element_type=jnp.float32)  # (h, tq, e)
    out = jnp.sum(per_head, axis=0) + b_ref[...]  # (tq, e) + (1, e)
    out_ref[...] = out.astype(out_ref.dtype)


# ---------------------------------------------------------------------------
# Wrapper: parameter layout plumbing + two pallas_calls.
# Weights are given in torch nn.Linear layout: W[out_features, in_features].
# ---------------------------------------------------------------------------
def attention_wide(x, y, Wk, Wq, Wv, Wu, bu, *, heads):
    t, e = x.shape
    h = heads
    he = h * e

    # Pre-transpose / pre-cast parameters (one-time, wrapper-side).
    wq_t = Wq.T.astype(jnp.bfloat16)                                   # (e, h*e)
    wkv_t = jnp.concatenate([Wk.T, Wv.T], axis=1).astype(jnp.bfloat16)  # (e, 2*h*e)
    wu3 = Wu.T.reshape(h, e, e).astype(jnp.bfloat16)                    # (h, e, e_out)
    bias = bu.reshape(1, e).astype(jnp.float32)

    cparams = pltpu.CompilerParams(
        dimension_semantics=("parallel",),
        vmem_limit_bytes=32 * 1024 * 1024,  # explicit budget; fits v5e/v6e/v7x
    )

    # --- Kernel A: QKV projections --------------------------------------
    bt = t                     # row tile (tile for large t; full here)
    nt = pl.cdiv(t, bt)
    q_wide, kv_wide = pl.pallas_call(
        _qkv_proj_kernel,
        grid=(nt,),
        in_specs=[
            pl.BlockSpec((bt, e), lambda i: (i, 0)),       # y  (queries input)
            pl.BlockSpec((bt, e), lambda i: (i, 0)),       # x  (keys/values input)
            pl.BlockSpec((e, he), lambda i: (0, 0)),       # Wq^T (resident)
            pl.BlockSpec((e, 2 * he), lambda i: (0, 0)),   # [Wk^T | Wv^T]
        ],
        out_specs=[
            pl.BlockSpec((bt, he), lambda i: (i, 0)),
            pl.BlockSpec((bt, 2 * he), lambda i: (i, 0)),
        ],
        out_shape=[
            jax.ShapeDtypeStruct((t, he), jnp.bfloat16),
            jax.ShapeDtypeStruct((t, 2 * he), jnp.bfloat16),
        ],
        compiler_params=cparams,
    )(y, x, wq_t, wkv_t)

    # Wrapper-side layout plumbing: split heads, (t, h, e) -> (h, t, e).
    k_wide = kv_wide[:, :he]
    v_wide = kv_wide[:, he:]
    q3 = q_wide.reshape(t, h, e).transpose(1, 0, 2)
    k3 = k_wide.reshape(t, h, e).transpose(1, 0, 2)
    v3 = v_wide.reshape(t, h, e).transpose(1, 0, 2)

    # --- Kernel B: attention + unifyheads, tiled over query rows --------
    tq = t                     # query tile (tile for large t; full here)
    nq = pl.cdiv(t, tq)
    out = pl.pallas_call(
        partial(_attn_unify_kernel, emb=e),
        grid=(nq,),
        in_specs=[
            pl.BlockSpec((h, tq, e), lambda i: (0, i, 0)),  # q tile
            pl.BlockSpec((h, t, e), lambda i: (0, 0, 0)),   # k (whole, exact softmax)
            pl.BlockSpec((h, t, e), lambda i: (0, 0, 0)),   # v (whole)
            pl.BlockSpec((h, e, e), lambda i: (0, 0, 0)),   # Wu per-head (resident)
            pl.BlockSpec((1, e), lambda i: (0, 0)),         # bias
        ],
        out_specs=pl.BlockSpec((tq, e), lambda i: (i, 0)),
        out_shape=jax.ShapeDtypeStruct((t, e), jnp.float32),
        compiler_params=cparams,
    )(q3, k3, v3, wu3, bias)

    return out.reshape(1, t, e)


# ---------------------------------------------------------------------------
# Pure-JAX f32 reference (mirrors the torch module, dropout in eval mode).
# ---------------------------------------------------------------------------
def _reference(x, y, Wk, Wq, Wv, Wu, bu, heads):
    t, e = x.shape
    h = heads
    keys = (x @ Wk.T).reshape(t, h, e)
    queries = (y @ Wq.T).reshape(t, h, e)     # dropout == identity (eval)
    values = (x @ Wv.T).reshape(t, h, e)
    keys = jnp.transpose(keys, (1, 0, 2))     # (h, t, e)
    queries = jnp.transpose(queries, (1, 0, 2))
    values = jnp.transpose(values, (1, 0, 2))
    queries = queries / (e ** 0.25)
    keys = keys / (e ** 0.25)
    dot = jnp.einsum("hqe,hke->hqk", queries, keys)
    dot = jax.nn.softmax(dot, axis=-1)
    out = jnp.einsum("hqk,hke->hqe", dot, values)          # (h, t, e)
    out = jnp.transpose(out, (1, 0, 2)).reshape(t, h * e)  # (t, h*e)
    return (out @ Wu.T + bu).reshape(1, t, e)


if __name__ == "__main__":
    # Small shapes implied by the forward: x, y are [seq, emb].
    t, e, h = 8, 32, 8

    # TODO(synk): nn.Dropout(p=0.2) on the query projection is treated as
    # identity (eval mode); training-mode dropout is not implemented in-kernel.

    key = jax.random.PRNGKey(0)
    kx, ky, k1, k2, k3, k4, k5 = jax.random.split(key, 7)
    x = jax.random.normal(kx, (t, e), jnp.float32)
    y = jax.random.normal(ky, (t, e), jnp.float32)

    # torch nn.Linear-style deterministic init (W: [out_features, in_features]).
    bound = 1.0 / math.sqrt(e)
    Wk = jax.random.uniform(k1, (h * e, e), jnp.float32, -bound, bound)
    Wq = jax.random.uniform(k2, (h * e, e), jnp.float32, -bound, bound)
    Wv = jax.random.uniform(k3, (h * e, e), jnp.float32, -bound, bound)
    ubound = 1.0 / math.sqrt(h * e)
    Wu = jax.random.uniform(k4, (e, h * e), jnp.float32, -ubound, ubound)
    bu = jax.random.uniform(k5, (e,), jnp.float32, -ubound, ubound)

    out = attention_wide(x, y, Wk, Wq, Wv, Wu, bu, heads=h)
    out = jax.block_until_ready(out)

    ref = _reference(x, y, Wk, Wq, Wv, Wu, bu, h)
    assert out.shape == (1, t, e)
    # bf16 MXU inputs (f32 accumulation) + approx reciprocal loosen the
    # tolerance vs. the pure-f32 reference.
    assert jnp.allclose(out, ref, atol=3e-2, rtol=3e-2), (
        float(jnp.max(jnp.abs(out - ref))))

    print("KERNEL_OK")
</pallas_src>

<mosaic_0001>
module attributes {stable_mosaic.version = 11 : i64} {
  func.func @_qkv_proj_kernel(%arg0: i32, %arg1: memref<8x32xf32, #tpu.memory_space<vmem>>, %arg2: memref<8x32xf32, #tpu.memory_space<vmem>>, %arg3: memref<32x256xbf16, #tpu.memory_space<vmem>>, %arg4: memref<32x512xbf16, #tpu.memory_space<vmem>>, %arg5: memref<8x256xbf16, #tpu.memory_space<vmem>>, %arg6: memref<8x512xbf16, #tpu.memory_space<vmem>>) attributes {dimension_semantics = [#tpu.dimension_semantics<parallel>], iteration_bounds = array<i64: 1>, scalar_prefetch = 0 : i64, scratch_operands = 0 : i64, tpu.core_type = #tpu.core_type<tc>, window_params = [{transform_indices = @transform_0, window_bounds = array<i64: 8, 32>}, {transform_indices = @transform_1, window_bounds = array<i64: 8, 32>}, {pipeline_mode = #tpu.pipeline_mode<synchronous>, transform_indices = @transform_2, window_bounds = array<i64: 32, 256>}, {pipeline_mode = #tpu.pipeline_mode<synchronous>, transform_indices = @transform_3, window_bounds = array<i64: 32, 512>}, {transform_indices = @transform_4, window_bounds = array<i64: 8, 256>}, {transform_indices = @transform_5, window_bounds = array<i64: 8, 512>}]} {
    %c0 = arith.constant 0 : index
    %c0_0 = arith.constant 0 : index
    %0 = vector.load %arg1[%c0, %c0_0] : memref<8x32xf32, #tpu.memory_space<vmem>>, vector<8x32xf32>
    %1 = arith.truncf %0 : vector<8x32xf32> to vector<8x32xbf16>
    %c0_1 = arith.constant 0 : index
    %c0_2 = arith.constant 0 : index
    %2 = vector.load %arg2[%c0_1, %c0_2] : memref<8x32xf32, #tpu.memory_space<vmem>>, vector<8x32xf32>
    %3 = arith.truncf %2 : vector<8x32xf32> to vector<8x32xbf16>
    %c0_3 = arith.constant 0 : index
    %c0_4 = arith.constant 0 : index
    %4 = vector.load %arg3[%c0_3, %c0_4] : memref<32x256xbf16, #tpu.memory_space<vmem>>, vector<32x256xbf16>
    %cst = arith.constant dense<0.000000e+00> : vector<8x256xf32>
    %5 = tpu.matmul %1, %4, %cst {dimension_numbers = #tpu.dot_dimension_numbers<[1], [0], [0], [1], [0, 0, 1, 1], [], []>} : vector<8x32xbf16>, vector<32x256xbf16>, vector<8x256xf32> -> vector<8x256xf32>
    %c0_5 = arith.constant 0 : index
    %c0_6 = arith.constant 0 : index
    %6 = vector.load %arg4[%c0_5, %c0_6] : memref<32x512xbf16, #tpu.memory_space<vmem>>, vector<32x512xbf16>
    %cst_7 = arith.constant dense<0.000000e+00> : vector<8x512xf32>
    %7 = tpu.matmul %3, %6, %cst_7 {dimension_numbers = #tpu.dot_dimension_numbers<[1], [0], [0], [1], [0, 0, 1, 1], [], []>} : vector<8x32xbf16>, vector<32x512xbf16>, vector<8x512xf32> -> vector<8x512xf32>
    %8 = arith.truncf %5 : vector<8x256xf32> to vector<8x256xbf16>
    %c0_8 = arith.constant 0 : index
    %c0_9 = arith.constant 0 : index
    %9 = vector.load %arg5[%c0_8, %c0_9] : memref<8x256xbf16, #tpu.memory_space<vmem>>, vector<8x256xbf16>
    tpu.vector_store %arg5[%c0_8, %c0_9], %8 {strides = array<i32>} : memref<8x256xbf16, #tpu.memory_space<vmem>>, vector<8x256xbf16>,
    %10 = arith.truncf %7 : vector<8x512xf32> to vector<8x512xbf16>
    %c0_10 = arith.constant 0 : index
    %c0_11 = arith.constant 0 : index
    %11 = vector.load %arg6[%c0_10, %c0_11] : memref<8x512xbf16, #tpu.memory_space<vmem>>, vector<8x512xbf16>
    tpu.vector_store %arg6[%c0_10, %c0_11], %10 {strides = array<i32>} : memref<8x512xbf16, #tpu.memory_space<vmem>>, vector<8x512xbf16>,
    return
  }
  func.func @transform_0(%arg0: i32) -> (i32, i32) {
    %c0_i32 = arith.constant 0 : i32
    %c0_i32_0 = arith.constant 0 : i32
    return %arg0, %c0_i32 : i32, i32
  }
  func.func @transform_1(%arg0: i32) -> (i32, i32) {
    %c0_i32 = arith.constant 0 : i32
    %c0_i32_0 = arith.constant 0 : i32
    return %arg0, %c0_i32 : i32, i32
  }
  func.func @transform_2(%arg0: i32) -> (i32, i32) {
    %c0_i32 = arith.constant 0 : i32
    %c0_i32_0 = arith.constant 0 : i32
    %c0_i32_1 = arith.constant 0 : i32
    return %c0_i32, %c0_i32_0 : i32, i32
  }
  func.func @transform_3(%arg0: i32) -> (i32, i32) {
    %c0_i32 = arith.constant 0 : i32
    %c0_i32_0 = arith.constant 0 : i32
    %c0_i32_1 = arith.constant 0 : i32
    return %c0_i32, %c0_i32_0 : i32, i32
  }
  func.func @transform_4(%arg0: i32) -> (i32, i32) {
    %c0_i32 = arith.constant 0 : i32
    %c0_i32_0 = arith.constant 0 : i32
    return %arg0, %c0_i32 : i32, i32
  }
  func.func @transform_5(%arg0: i32) -> (i32, i32) {
    %c0_i32 = arith.constant 0 : i32
    %c0_i32_0 = arith.constant 0 : i32
    return %arg0, %c0_i32 : i32, i32
  }
}

</mosaic_0001>

<bundles_post_ra>
// kernel: tpu_custom_call.1
= control target key start
LH: loop header
LB: loop body
LE: loop exit
PB: predicated region body
PF: predicated region fallthrough
CT: control target
= control target key end

     0   :  { %11 = vsyncpa [#allocation3], 0  ;;  %s642_s0 = inlined_call_operand.hbm [shape: f32[8,32], index: 0, kind: input, shape index: {}]   ;;  %s643_s1 = inlined_call_operand.hbm [shape: f32[8,32], index: 1, kind: input, shape index: {}]   ;;  %s644_s2 = inlined_call_operand.hbm [shape: bf16[32,256], index: 2, kind: input, shape index: {}]   ;;  %s645_s3 = inlined_call_operand.hbm [shape: bf16[32,512], index: 3, kind: input, shape index: {}]   ;;  %s646_s4 = inlined_call_operand.hbm [shape: bf16[8,256], index: 4, kind: output, shape index: {0}]   ;;  %s647_s5 = inlined_call_operand.hbm [shape: bf16[8,512], index: 5, kind: output, shape index: {1}]  }
   0x1   :  { %12 = vsyncpa [#allocation6], 0 }
   0x2   :  { %13 = vsyncpa [#allocation9], 0 }
   0x3   :  { %14 = vsyncpa [#allocation4], 0 }
   0x4   :  { %15 = vsyncpa [#allocation12], 0  ;;  %s529_s18 = smov [#allocation5]   ;;  %s530_s20 = smov [#allocation2]  }
   0x5   :  { %s32_s19 = sshll.u32 %s529_s18, 4  ;;  %s22_s21 = sshll.u32 %s530_s20, 4  ;;  %s33_s19 = int_to_ptr.vmem [resolvable:$true] %s32_s19  ;;  %s23_s21 = int_to_ptr.vmem [resolvable:$true] %s22_s21 }
   0x6   :  { %s387_s24 = scalar_lea.hbm %s643_s1, 128 }
   0x7   :  { %p388_p0 = scmp.ne.s32.totalorder %s643_s1, %s387_s24  ;;  %p391_p1 = scmp.lt.u32.totalorder %s387_s24, %s643_s1 }
   0x9   :  { %p393_p2 = pnand %p391_p1, %p388_p0 }
   0xb   :  { %396 = shalt.err (!%p393_p2)
}
   0xc   :  { %s397_s29 = scalar_lea.vmem %s33_s19, 128  ;;  %p402_p4 = scmp.lt.s32.totalorder %s33_s19, %s33_s19 }
   0xd   :  { %p398_p3 = scmp.ne.s32.totalorder %s33_s19, %s397_s29  ;;  %p403_p5 = scmp.lt.s32.totalorder %s397_s29, %s397_s29 }
   0xf   :  { %p404_p6 = por %p403_p5, %p402_p4 }
  0x11   :  { %p405_p7 = pnand %p404_p6, %p398_p3 }
  0x13   :  { %408 = shalt.err (!%p405_p7)
}
  0x14   :  { %35 = dma.hbm_to_vmem [thread:$0]  %s643_s1, 128, %s33_s19, [#allocation6]  }
  0x15   :  { %s409_s9 = scalar_lea.hbm %s642_s0, 128 }
  0x16   :  { %p410_p8 = scmp.ne.s32.totalorder %s642_s0, %s409_s9  ;;  %p413_p9 = scmp.lt.u32.totalorder %s409_s9, %s642_s0 }
  0x18   :  { %p415_p10 = pnand %p413_p9, %p410_p8 }
  0x1a   :  { %418 = shalt.err (!%p415_p10)
}
  0x1b   :  { %s419_s14 = scalar_lea.vmem %s23_s21, 128  ;;  %p424_p12 = scmp.lt.s32.totalorder %s23_s21, %s23_s21 }
  0x1c   :  { %p420_p11 = scmp.ne.s32.totalorder %s23_s21, %s419_s14  ;;  %p425_p13 = scmp.lt.s32.totalorder %s419_s14, %s419_s14 }
  0x1e   :  { %p426_p0 = por %p425_p13, %p424_p12 }
  0x20   :  { %p427_p1 = pnand %p426_p0, %p420_p11 }
  0x22   :  { %430 = shalt.err (!%p427_p1)
}
  0x23   :  { %25 = dma.hbm_to_vmem [thread:$0]  %s642_s0, 128, %s23_s21, [#allocation3]  }
  0x24   :  { %s531_s16 = smov [#allocation7]   ;;  %s431_s20 = scalar_lea.hbm %s644_s2, 512 }
  0x25   :  { %s41_s17 = sshll.u32 %s531_s16, 4  ;;  %p432_p2 = scmp.ne.s32.totalorder %s644_s2, %s431_s20  ;;  %s42_s17 = int_to_ptr.vmem [resolvable:$true] %s41_s17 }
  0x26   :  { %p435_p3 = scmp.lt.u32.totalorder %s431_s20, %s644_s2 }
  0x28   :  { %p437_p4 = pnand %p435_p3, %p432_p2 }
  0x2a   :  { %440 = shalt.err (!%p437_p4)
}
  0x2b   :  { %s441_s26 = scalar_lea.vmem %s42_s17, 512  ;;  %p446_p6 = scmp.lt.s32.totalorder %s42_s17, %s42_s17 }
  0x2c   :  { %p442_p5 = scmp.ne.s32.totalorder %s42_s17, %s441_s26  ;;  %p447_p7 = scmp.lt.s32.totalorder %s441_s26, %s441_s26 }
  0x2e   :  { %p448_p8 = por %p447_p7, %p446_p6 }
  0x30   :  { %p449_p9 = pnand %p448_p8, %p442_p5 }
  0x32   :  { %452 = shalt.err (!%p449_p9)
}
  0x33   :  { %s532_s0 = smov 128   ;;  %s533_s21 = smov 8  }
  0x34   :  { %47 = dma.hbm_to_vmem [thread:$0]  %s644_s2, 512, %s42_s17, [#allocation6], %s532_s0, %s532_s0, %s533_s21  }
  0x35   :  { %s534_s29 = smov [#allocation8]   ;;  %s453_s8 = scalar_lea.hbm %s645_s3, 1024 }
  0x36   :  { %s53_s30 = sshll.u32 %s534_s29, 4  ;;  %p454_p10 = scmp.ne.s32.totalorder %s645_s3, %s453_s8  ;;  %s54_s30 = int_to_ptr.vmem [resolvable:$true] %s53_s30 }
  0x37   :  { %p457_p11 = scmp.lt.u32.totalorder %s453_s8, %s645_s3 }
  0x39   :  { %p459_p12 = pnand %p457_p11, %p454_p10 }
  0x3b   :  { %462 = shalt.err (!%p459_p12)
}
  0x3c   :  { %s463_s13 = scalar_lea.vmem %s54_s30, 1024  ;;  %p468_p0 = scmp.lt.s32.totalorder %s54_s30, %s54_s30 }
  0x3d   :  { %p464_p13 = scmp.ne.s32.totalorder %s54_s30, %s463_s13  ;;  %p469_p1 = scmp.lt.s32.totalorder %s463_s13, %s463_s13 }
  0x3f   :  { %p470_p2 = por %p469_p1, %p468_p0 }
  0x41   :  { %p471_p3 = pnand %p470_p2, %p464_p13 }
  0x43   :  { %474 = shalt.err (!%p471_p3)
}
  0x44   :  { %s535_s2 = smov 256   ;;  %s536_s14 = smov 16  }
  0x45   :  { %59 = dma.hbm_to_vmem [thread:$0]  %s645_s3, 1024, %s54_s30, [#allocation9], %s535_s2, %s535_s2, %s536_s14  }
  0x46   :  { %519 = dma.done.wait [#allocation3], 128  }
  0x47   :  { %520 = vsyncadd [#allocation3], 4294967168 }
  0x48   :  { %521 = dma.done.wait [#allocation6], 640  }
  0x49   :  { %522 = vsyncadd [#allocation6], 4294966656 }
  0x4a   :  { %523 = dma.done.wait [#allocation9], 1024  }
  0x4b   :  { %524 = vsyncadd [#allocation9], 4294966272  ;;  %v537_v0 = vmov 0   ;;  %v369_v1 = vld [vmem:[#allocation7 + $0x4] ss:$8 sps:$4 sm:$0xff]   ;;  %v73_v7 = vld [vmem:[#allocation2] sm:$0xff] }
  0x4c   :  { %137 = vmatprep.mubr.bf16.mxu0 %v537_v0  ;;  %229 = vmatprep.mubr.bf16.mxu1 %v537_v0  ;;  %v371_v2 = vld [vmem:[#allocation7] ss:$8 sps:$4 sm:$0xff]   ;;  %v372_v3 = vld [vmem:[#allocation7 + $0x14] ss:$8 sps:$4 sm:$0xff]   ;;  %v374_v4 = vld [vmem:[#allocation7 + $0x10] ss:$8 sps:$4 sm:$0xff]   ;;  %v74_v9 = vpack.c.bf16 %v73_v7, %v73_v7 }
  0x4d   :  { %105 = vmatprep.subr.bf16.mxu0 %v369_v1  ;;  %v375_v5 = vld [vmem:[#allocation8 + $0x4] ss:$16 sps:$4 sm:$0xff]   ;;  %v377_v6 = vld [vmem:[#allocation8] ss:$16 sps:$4 sm:$0xff]   ;;  %v380_v8 = vld [vmem:[#allocation8 + $0xc] ss:$16 sps:$4 sm:$0xff]  }
  0x4e   :  { %106 = vmatpush1.bf16.msra.mxu0 %v371_v2  ;;  %197 = vmatprep.subr.bf16.mxu1 %v375_v5  ;;  %v381_v10 = vld [vmem:[#allocation8 + $0x24] ss:$16 sps:$4 sm:$0xff]   ;;  %v383_v11 = vld [vmem:[#allocation8 + $0x20] ss:$16 sps:$4 sm:$0xff]   ;;  %vm101_vm0 = vcmask 261120   ;;  %v75_v14 = vld [vmem:[#allocation5] sm:$0xff] }
  0x4f   :  { %107 = vmatprep.subr.bf16.mxu0 %v372_v3  ;;  %198 = vmatpush1.bf16.msra.mxu1 %v377_v6  ;;  %v378_v12 = vld [vmem:[#allocation8 + $0x8] ss:$16 sps:$4 sm:$0xff]   ;;  %v386_v13 = vld [vmem:[#allocation8 + $0x2c] ss:$16 sps:$4 sm:$0xff]   ;;  %v76_v15 = vpack.c.bf16 %v75_v14, %v75_v14  ;;  %s538_s3 = smov [#allocation10]  }
  0x50   :  { %199 = vmatprep.subr.bf16.mxu1 %v381_v10  ;;  %v384_v16 = vld [vmem:[#allocation8 + $0x28] ss:$16 sps:$4 sm:$0xff]   ;;  %s312_s16 = sshll.u32 %s538_s3, 4  ;;  %s313_s16 = int_to_ptr.vmem [resolvable:$true] %s312_s16 }
  0x51   :  { %s475_s17 = scalar_lea.vmem %s313_s16, 128  ;;  %p480_p5 = scmp.lt.s32.totalorder %s313_s16, %s313_s16 }
  0x52   :  { %108 = vmatpush1.bf16.msra.mxu0 %v374_v4  ;;  %p476_p4 = scmp.ne.s32.totalorder %s313_s16, %s475_s17  ;;  %p481_p6 = scmp.lt.s32.totalorder %s475_s17, %s475_s17 }
  0x53   :  { %238 = vmatprep.subr.bf16.mxu0 %v380_v8  ;;  %200 = vmatpush1.bf16.msra.mxu1 %v383_v11 }
  0x54   :  { %p482_p7 = por %p481_p6, %p480_p5 }
  0x55   :  { %341 = vmatmul.mubr.msk.bf16.vlgmr.msra.gmra.mrb[0].mxu0 %vm101_vm0, %v74_v9 }
  0x56   :  { %239 = vmatpush1.bf16.msra.mxu0 %v378_v12  ;;  %270 = vmatprep.mubr.bf16.mxu0 %v537_v0  ;;  %p483_p8 = pnand %p482_p7, %p476_p4 }
  0x57   :  { %240 = vmatprep.subr.bf16.mxu0 %v386_v13  ;;  %350 = vmatmul.mubr.msk.bf16.vlgmr.msra.gmra.mrb[0].mxu1 %vm101_vm0, %v76_v15 }
  0x5a   :  { %241 = vmatpush1.bf16.msra.mxu0 %v384_v16 }
  0x5d   :  { %351 = vmatmul.mubr.msk.bf16.vlgmr.msra.gmra.mrb[4].mxu0 %vm101_vm0, %v76_v15 }
 0x128   :  { %v139_v17 = vpop.f32.mrb[0].mxu0 }
 0x129   :  { %v141_v18 = vpop.f32.mrb[1].mxu0 }
 0x12a   :  { %v355_v19 = vpack.c.bf16 %v141_v18, %v139_v17  ;;  %v143_v20 = vpop.f32.mrb[2].mxu0  ;;  %v231_v22 = vpop.f32.mrb[0].mxu1 }
 0x12b   :  { %v144_v21 = vpop.f32.mrb[3].mxu0  ;;  %v233_v23 = vpop.f32.mrb[1].mxu1 }
 0x12c   :  { %287 = vst [vmem:[#allocation10] sm:$0xff] %v355_v19  ;;  %v356_v24 = vpack.c.bf16 %v233_v23, %v231_v22  ;;  %v235_v25 = vpop.f32.mrb[2].mxu1 }
 0x12d   :  { %486 = shalt.err (!%p483_p8)
}
 0x12e   :  { %s487_s20 = scalar_lea.hbm %s646_s4, 128 }
 0x12f   :  { %p488_p9 = scmp.ne.s32.totalorder %s646_s4, %s487_s20  ;;  %p491_p10 = scmp.lt.u32.totalorder %s487_s20, %s646_s4 }
 0x131   :  { %p493_p11 = pnand %p491_p10, %p488_p9 }
 0x133   :  { %496 = shalt.err (!%p493_p11)
}
 0x134   :  { %315 = dma.vmem_to_hbm [thread:$0]  %s313_s16, 128, %s646_s4, [#allocation4]   ;;  %v236_v26 = vpop.f32.mrb[3].mxu1  ;;  %304 = vst [vmem:[#allocation11] sm:$0xff] %v356_v24  ;;  %v272_v27 = vpop.f32.mrb[4].mxu0 }
 0x135   :  { %s539_s21 = smov [#allocation11]   ;;  %v274_v28 = vpop.f32.mrb[5].mxu0 }
 0x136   :  { %s322_s27 = sshll.u32 %s539_s21, 4  ;;  %v357_v29 = vpack.c.bf16 %v274_v28, %v272_v27  ;;  %v276_v30 = vpop.f32.mrb[6].mxu0  ;;  %s323_s27 = int_to_ptr.vmem [resolvable:$true] %s322_s27 }
 0x137   :  { %v277_v31 = vpop.f32.mrb[7].mxu0  ;;  %s497_s28 = scalar_lea.vmem %s323_s27, 256  ;;  %p502_p13 = scmp.lt.s32.totalorder %s323_s27, %s323_s27 }
 0x138   :  { %305 = vst [vmem:[#allocation11 + $0x8] sm:$0xff] %v357_v29  ;;  %p498_p12 = scmp.ne.s32.totalorder %s323_s27, %s497_s28  ;;  %p503_p0 = scmp.lt.s32.totalorder %s497_s28, %s497_s28 }
 0x13a   :  { %p504_p1 = por %p503_p0, %p502_p13 }
 0x13c   :  { %p505_p2 = pnand %p504_p1, %p498_p12 }
 0x13e   :  { %508 = shalt.err (!%p505_p2)
}
 0x13f   :  { %s509_s30 = scalar_lea.hbm %s647_s5, 256 }
 0x140   :  { %p510_p3 = scmp.ne.s32.totalorder %s647_s5, %s509_s30  ;;  %p513_p4 = scmp.lt.u32.totalorder %s509_s30, %s647_s5 }
 0x142   :  { %p515_p5 = pnand %p513_p4, %p510_p3 }
 0x144   :  { %518 = shalt.err (!%p515_p5)
}
 0x145   :  { %325 = dma.vmem_to_hbm [thread:$0]  %s323_s27, 256, %s647_s5, [#allocation12]  }
 0x146   :  { %525 = dma.done.wait [#allocation4], 128  }
 0x147   :  { %526 = vsyncadd [#allocation4], 4294967168 }
 0x148   :  { %527 = dma.done.wait [#allocation12], 256  }
 0x149   :  { %528 = vsyncadd [#allocation12], 4294967040 }
 0x14a   :  { %332 = vsyncpa [#allocation3], 1 }
 0x14b   :  { %333 = vsyncpa [#allocation6], 1 }
 0x14c   :  { %334 = vsyncpa [#allocation9], 1 }
 0x14d   :  { %335 = vsyncpa [#allocation4], 1 }
 0x14e   :  { %336 = vsyncpa [#allocation12], 1 }

</bundles_post_ra>
